<compile_context>
chip_gen: v5e
topology: v5e:2x2
jax: 0.10.0
libtpu: 0.0.40
codegen_flags: <defaults>
</compile_context>

<pallas_src>
import functools
import math

import jax
import jax.numpy as jnp
from jax.experimental import pallas as pl
from jax.experimental.pallas import tpu as pltpu

_LANE = 128
_PAD_LOGIT = -1.0e4   # sigmoid(-1e4) == 0.0 exactly in f32 -> padded elems add 0


def _round_up(x, m):
    return -(-x // m) * m


def _sam_loss_kernel(pred_ref, tgt_ref, out_ref, *, alpha, gamma):
    # pred_ref / tgt_ref : (B, T_SUB, 128) blocks (native dtype, cast below)
    # out_ref            : (1, 3, B, 128) resident accumulator block
    @pl.when(pl.program_id(1) == 0)
    def _init():
        out_ref[...] = jnp.zeros_like(out_ref)

    logits = pred_ref[...].astype(jnp.float32)
    t = tgt_ref[...].astype(jnp.float32)

    p = jax.nn.sigmoid(logits)

    # ---------------- Focal-loss elementwise path ----------------
    # No validity mask: padding uses logits=-1e4 (p==0) and t==0, so
    # prod = 0, psum = 0, pt = 1, mod = 0, bce = 0 -> contributes exactly 0.
    is_pos = t == 1.0
    pt = jnp.where(is_pos, p, 1.0 - p)
    alpha_factor = jnp.where(is_pos, alpha, 1.0 - alpha)
    if gamma == 2.0:
        mod = jnp.square(1.0 - pt)            # VALU, avoids exp/log pow path
    else:
        mod = (1.0 - pt) ** gamma
    # Binary target => t*log(p) + (1-t)*log(1-p) == log(pt); clamp at -100
    # to match PyTorch F.binary_cross_entropy.
    bce = -jnp.maximum(jnp.log(pt), -100.0)
    focal_elem = alpha_factor * mod * bce

    # ---------------- Dice partials ----------------
    prod = p * t                              # intersection terms
    psum = p + t                              # fused union terms

    # Reduce only the sublane axis here; the lane axis (128) is reduced once
    # in the (tiny) wrapper finalize.
    out_ref[0, 0] += jnp.sum(prod, axis=1)        # (B, 128) intersection
    out_ref[0, 1] += jnp.sum(psum, axis=1)        # (B, 128) union
    out_ref[0, 2] += jnp.sum(focal_elem, axis=1)  # (B, 128) focal sum


def _chip_params():
    """Return (num_tensorcores, input_double_buffer_budget, vmem_limit_bytes)."""
    try:
        kind = jax.devices()[0].device_kind.lower()
    except Exception:
        kind = ""
    is_v7 = "v7" in kind

    vmem_phys = None
    try:
        vmem_phys = int(pltpu.get_tpu_info().vmem_capacity_bytes)
    except Exception:
        vmem_phys = None
    if vmem_phys is None:
        vmem_phys = (64 if is_v7 else 128) * 1024 * 1024

    if vmem_phys >= 100 * 1024 * 1024:        # v5e / v6e: 128 MiB physical VMEM
        budget = 40 * 1024 * 1024
        vmem_limit = 64 * 1024 * 1024
    else:                                     # v7x: 64 MiB physical, 32 MiB scoped
        budget = 20 * 1024 * 1024
        vmem_limit = 32 * 1024 * 1024
    num_tc = 2 if is_v7 else 1
    return num_tc, budget, vmem_limit


def sam_loss(pred, target, *, dice_weight=1.0, focal_weight=1.0,
             dice_eps=1e-7, alpha=0.25, gamma=2.0):
    """pred, target: [B, 1, H, W] (pred = logits, target = {0,1} mask).

    pred / target may be any float/int dtype; the kernel casts to f32 after
    the HBM load, so narrow dtypes (bf16 preds, int8/uint8 masks) cut HBM
    traffic proportionally.
    """
    B = pred.shape[0]
    N = math.prod(pred.shape[1:])

    # Keep native dtypes in HBM; cast to f32 inside the kernel.
    pred2 = pred.reshape(B, N)
    target2 = target.reshape(B, N)

    num_tc, budget, vmem_limit = _chip_params()

    # ---- Tile sizing: grow toward the budget, then split for pipelining ----
    nr = -(-N // _LANE)                                   # rows of 128 lanes
    num_par = num_tc if (num_tc > 1 and nr >= 16) else 1  # only split big inputs
    rows_per_chunk = -(-nr // num_par)

    in_itemsize = pred2.dtype.itemsize + target2.dtype.itemsize
    per_row_bytes = 2 * B * _LANE * in_itemsize           # double-buffered inputs
    t_cap = max(8, (budget // per_row_bytes) // 8 * 8)

    t_sub = min(t_cap, _round_up(rows_per_chunk, 8))
    # Keep >= 2 pipelined steps per chunk (overlap DMA with compute) as long
    # as each block still has >= 512 rows to amortize per-step overhead.
    if rows_per_chunk >= 1024:
        t_sub = min(t_sub, _round_up(-(-rows_per_chunk // 2), 8))
    t_sub = max(8, t_sub)

    n_inner = -(-rows_per_chunk // t_sub)
    nr_pad = num_par * n_inner * t_sub
    n_pad = nr_pad * _LANE

    if n_pad != N:
        # Rare path (odd H*W or tiny inputs): pad pred with a large negative
        # logit so sigmoid == 0.0 exactly and target with 0 -> padded elements
        # contribute exactly 0; no in-kernel mask required.
        pred2 = jnp.pad(pred2, ((0, 0), (0, n_pad - N)),
                        constant_values=_PAD_LOGIT)
        target2 = jnp.pad(target2, ((0, 0), (0, n_pad - N)))
    pred3 = pred2.reshape(B, nr_pad, _LANE)
    target3 = target2.reshape(B, nr_pad, _LANE)

    kernel = functools.partial(_sam_loss_kernel,
                               alpha=float(alpha), gamma=float(gamma))

    cost = pl.CostEstimate(
        flops=14 * B * n_pad,
        transcendentals=2 * B * n_pad,   # sigmoid + one log per element
        bytes_accessed=pred3.size * pred3.dtype.itemsize
                       + target3.size * target3.dtype.itemsize
                       + num_par * 3 * B * _LANE * 4,
    )

    partials = pl.pallas_call(
        kernel,
        out_shape=jax.ShapeDtypeStruct((num_par, 3, B, _LANE), jnp.float32),
        grid=(num_par, n_inner),
        in_specs=[
            pl.BlockSpec((B, t_sub, _LANE),
                         lambda p, n: (0, p * n_inner + n, 0)),
            pl.BlockSpec((B, t_sub, _LANE),
                         lambda p, n: (0, p * n_inner + n, 0)),
        ],
        out_specs=pl.BlockSpec((1, 3, B, _LANE), lambda p, n: (p, 0, 0, 0)),
        compiler_params=pltpu.CompilerParams(
            dimension_semantics=("parallel", "arbitrary"),
            vmem_limit_bytes=vmem_limit),
        cost_estimate=cost,
    )(pred3, target3)

    # ---- Tiny scalar finalize (a few ops over (P, 3, B, 128) partials) ----
    inter = jnp.sum(partials[:, 0], axis=(0, 2))          # (B,)
    union = jnp.sum(partials[:, 1], axis=(0, 2))          # (B,)
    dice = (2.0 * inter + dice_eps) / (union + dice_eps)
    dice_loss = 1.0 - jnp.mean(dice)
    focal_loss = jnp.sum(partials[:, 2]) / (B * N)        # true N, pads add 0
    return dice_weight * dice_loss + focal_weight * focal_loss


def _sam_loss_ref(pred, target, dice_weight=1.0, focal_weight=1.0,
                  dice_eps=1e-7, alpha=0.25, gamma=2.0):
    """Pure-JAX reference (mirrors the PyTorch module)."""
    B = pred.shape[0]
    p = jax.nn.sigmoid(pred.reshape(B, -1).astype(jnp.float32))
    t = target.reshape(B, -1).astype(jnp.float32)

    inter = jnp.sum(p * t, axis=1)
    union = jnp.sum(p, axis=1) + jnp.sum(t, axis=1)
    dice = (2.0 * inter + dice_eps) / (union + dice_eps)
    dice_loss = 1.0 - jnp.mean(dice)

    pt = jnp.where(t == 1.0, p, 1.0 - p)
    af = jnp.where(t == 1.0, alpha, 1.0 - alpha)
    fw = af * (1.0 - pt) ** gamma
    bce = -(t * jnp.maximum(jnp.log(p), -100.0)
            + (1.0 - t) * jnp.maximum(jnp.log(1.0 - p), -100.0))
    focal_loss = jnp.mean(fw * bce)

    return dice_weight * dice_loss + focal_weight * focal_loss


# TODO(synk): the PyTorch module's shape-fixup fallbacks (unsqueeze +
# F.interpolate when pred/target dims mismatch) are host-side control flow
# with no Pallas equivalent; this kernel implements the normal [B,1,H,W] path.

if __name__ == "__main__":
    key = jax.random.PRNGKey(0)
    k_pred, k_tgt = jax.random.split(key)

    B, C, H, W = 2, 1, 16, 16
    pred = jax.random.normal(k_pred, (B, C, H, W), dtype=jnp.float32)
    target = (jax.random.uniform(k_tgt, (B, C, H, W)) > 0.5).astype(jnp.float32)

    loss = jax.block_until_ready(sam_loss(pred, target))
    ref = jax.block_until_ready(_sam_loss_ref(pred, target))
    assert jnp.allclose(loss, ref, rtol=1e-4, atol=1e-5), (loss, ref)

    print("KERNEL_OK")
</pallas_src>

<mosaic_0001>
module attributes {stable_mosaic.version = 11 : i64} {
  func.func @_sam_loss_kernel(%arg0: i32, %arg1: i32, %arg2: memref<2x8x128xf32, #tpu.memory_space<vmem>>, %arg3: memref<2x8x128xf32, #tpu.memory_space<vmem>>, %arg4: memref<1x3x2x128xf32, #tpu.memory_space<vmem>>) attributes {dimension_semantics = [#tpu.dimension_semantics<parallel>, #tpu.dimension_semantics<arbitrary>], iteration_bounds = array<i64: 1, 1>, scalar_prefetch = 0 : i64, scratch_operands = 0 : i64, tpu.core_type = #tpu.core_type<tc>, window_params = [{transform_indices = @transform_0, window_bounds = array<i64: 2, 8, 128>}, {transform_indices = @transform_1, window_bounds = array<i64: 2, 8, 128>}, {transform_indices = @transform_2, window_bounds = array<i64: 1, 3, 2, 128>}]} {
    %c0_i32 = arith.constant 0 : i32
    %0 = arith.cmpi eq, %arg1, %c0_i32 : i32
    %1 = arith.extui %0 : i1 to i32
    %c0_i32_0 = arith.constant 0 : i32
    %2 = arith.cmpi ne, %1, %c0_i32_0 : i32
    scf.if %2 {
      %cst_38 = arith.constant 0.000000e+00 : f32
      %51 = vector.broadcast %cst_38 : f32 to vector<1x3x2x128xf32>
      %c0_39 = arith.constant 0 : index
      %c0_40 = arith.constant 0 : index
      %c0_41 = arith.constant 0 : index
      %c0_42 = arith.constant 0 : index
      %52 = vector.load %arg4[%c0_39, %c0_40, %c0_41, %c0_42] : memref<1x3x2x128xf32, #tpu.memory_space<vmem>>, vector<1x3x2x128xf32>
      tpu.vector_store %arg4[%c0_39, %c0_40, %c0_41, %c0_42], %51 {strides = array<i32>} : memref<1x3x2x128xf32, #tpu.memory_space<vmem>>, vector<1x3x2x128xf32>,
    } else {
    }
    %c0 = arith.constant 0 : index
    %c0_1 = arith.constant 0 : index
    %c0_2 = arith.constant 0 : index
    %3 = vector.load %arg2[%c0, %c0_1, %c0_2] : memref<2x8x128xf32, #tpu.memory_space<vmem>>, vector<2x8x128xf32>
    %c0_3 = arith.constant 0 : index
    %c0_4 = arith.constant 0 : index
    %c0_5 = arith.constant 0 : index
    %4 = vector.load %arg3[%c0_3, %c0_4, %c0_5] : memref<2x8x128xf32, #tpu.memory_space<vmem>>, vector<2x8x128xf32>
    %5 = arith.negf %3 : vector<2x8x128xf32>
    %6 = math.exp %5 : vector<2x8x128xf32>
    %cst = arith.constant 1.000000e+00 : f32
    %7 = vector.broadcast %cst : f32 to vector<2x8x128xf32>
    %8 = arith.addf %7, %6 : vector<2x8x128xf32>
    %9 = arith.divf %7, %8 : vector<2x8x128xf32>
    %cst_6 = arith.constant 1.000000e+00 : f32
    %10 = vector.broadcast %cst_6 : f32 to vector<2x8x128xf32>
    %11 = arith.cmpf oeq, %4, %10 : vector<2x8x128xf32>
    %cst_7 = arith.constant 1.000000e+00 : f32
    %12 = vector.broadcast %cst_7 : f32 to vector<2x8x128xf32>
    %13 = arith.subf %12, %9 : vector<2x8x128xf32>
    %14 = arith.select %11, %9, %13 : vector<2x8x128xi1>, vector<2x8x128xf32>
    %cst_8 = arith.constant 2.500000e-01 : f32
    %cst_9 = arith.constant 7.500000e-01 : f32
    %15 = vector.broadcast %cst_8 : f32 to vector<2x8x128xf32>
    %16 = vector.broadcast %cst_9 : f32 to vector<2x8x128xf32>
    %17 = arith.select %11, %15, %16 : vector<2x8x128xi1>, vector<2x8x128xf32>
    %cst_10 = arith.constant 1.000000e+00 : f32
    %18 = vector.broadcast %cst_10 : f32 to vector<2x8x128xf32>
    %19 = arith.subf %18, %14 : vector<2x8x128xf32>
    %20 = arith.mulf %19, %19 : vector<2x8x128xf32>
    %21 = math.log %14 : vector<2x8x128xf32>
    %cst_11 = arith.constant -1.000000e+02 : f32
    %22 = vector.broadcast %cst_11 : f32 to vector<2x8x128xf32>
    %23 = arith.maximumf %21, %22 : vector<2x8x128xf32>
    %cst_12 = arith.constant 0.000000e+00 : f32
    %24 = vector.broadcast %cst_12 : f32 to vector<2x8x128xf32>
    %25 = arith.subf %24, %23 : vector<2x8x128xf32>
    %26 = arith.mulf %17, %20 : vector<2x8x128xf32>
    %27 = arith.mulf %26, %25 : vector<2x8x128xf32>
    %28 = arith.mulf %9, %4 : vector<2x8x128xf32>
    %29 = arith.addf %9, %4 : vector<2x8x128xf32>
    %c0_13 = arith.constant 0 : index
    %c0_14 = arith.constant 0 : index
    %c0_15 = arith.constant 0 : index
    %c0_16 = arith.constant 0 : index
    %30 = vector.load %arg4[%c0_13, %c0_14, %c0_15, %c0_16] : memref<1x3x2x128xf32, #tpu.memory_space<vmem>>, vector<1x1x2x128xf32>
    %31 = vector.shape_cast %30 : vector<1x1x2x128xf32> to vector<2x128xf32>
    %cst_17 = arith.constant dense<0.000000e+00> : vector<2x128xf32>
    %32 = vector.multi_reduction <add>, %28, %cst_17 [1] : vector<2x8x128xf32> to vector<2x128xf32>
    %33 = arith.addf %31, %32 : vector<2x128xf32>
    %c0_18 = arith.constant 0 : index
    %c0_19 = arith.constant 0 : index
    %c0_20 = arith.constant 0 : index
    %c0_21 = arith.constant 0 : index
    %34 = vector.load %arg4[%c0_18, %c0_19, %c0_20, %c0_21] : memref<1x3x2x128xf32, #tpu.memory_space<vmem>>, vector<1x1x2x128xf32>
    %35 = vector.shape_cast %34 : vector<1x1x2x128xf32> to vector<2x128xf32>
    %36 = vector.shape_cast %33 : vector<2x128xf32> to vector<1x1x2x128xf32>
    tpu.vector_store %arg4[%c0_18, %c0_19, %c0_20, %c0_21], %36 {strides = array<i32>} : memref<1x3x2x128xf32, #tpu.memory_space<vmem>>, vector<1x1x2x128xf32>,
    %c0_22 = arith.constant 0 : index
    %c1 = arith.constant 1 : index
    %c0_23 = arith.constant 0 : index
    %c0_24 = arith.constant 0 : index
    %37 = vector.load %arg4[%c0_22, %c1, %c0_23, %c0_24] : memref<1x3x2x128xf32, #tpu.memory_space<vmem>>, vector<1x1x2x128xf32>
    %38 = vector.shape_cast %37 : vector<1x1x2x128xf32> to vector<2x128xf32>
    %cst_25 = arith.constant dense<0.000000e+00> : vector<2x128xf32>
    %39 = vector.multi_reduction <add>, %29, %cst_25 [1] : vector<2x8x128xf32> to vector<2x128xf32>
    %40 = arith.addf %38, %39 : vector<2x128xf32>
    %c0_26 = arith.constant 0 : index
    %c1_27 = arith.constant 1 : index
    %c0_28 = arith.constant 0 : index
    %c0_29 = arith.constant 0 : index
    %41 = vector.load %arg4[%c0_26, %c1_27, %c0_28, %c0_29] : memref<1x3x2x128xf32, #tpu.memory_space<vmem>>, vector<1x1x2x128xf32>
    %42 = vector.shape_cast %41 : vector<1x1x2x128xf32> to vector<2x128xf32>
    %43 = vector.shape_cast %40 : vector<2x128xf32> to vector<1x1x2x128xf32>
    tpu.vector_store %arg4[%c0_26, %c1_27, %c0_28, %c0_29], %43 {strides = array<i32>} : memref<1x3x2x128xf32, #tpu.memory_space<vmem>>, vector<1x1x2x128xf32>,
    %c0_30 = arith.constant 0 : index
    %c2 = arith.constant 2 : index
    %c0_31 = arith.constant 0 : index
    %c0_32 = arith.constant 0 : index
    %44 = vector.load %arg4[%c0_30, %c2, %c0_31, %c0_32] : memref<1x3x2x128xf32, #tpu.memory_space<vmem>>, vector<1x1x2x128xf32>
    %45 = vector.shape_cast %44 : vector<1x1x2x128xf32> to vector<2x128xf32>
    %cst_33 = arith.constant dense<0.000000e+00> : vector<2x128xf32>
    %46 = vector.multi_reduction <add>, %27, %cst_33 [1] : vector<2x8x128xf32> to vector<2x128xf32>
    %47 = arith.addf %45, %46 : vector<2x128xf32>
    %c0_34 = arith.constant 0 : index
    %c2_35 = arith.constant 2 : index
    %c0_36 = arith.constant 0 : index
    %c0_37 = arith.constant 0 : index
    %48 = vector.load %arg4[%c0_34, %c2_35, %c0_36, %c0_37] : memref<1x3x2x128xf32, #tpu.memory_space<vmem>>, vector<1x1x2x128xf32>
    %49 = vector.shape_cast %48 : vector<1x1x2x128xf32> to vector<2x128xf32>
    %50 = vector.shape_cast %47 : vector<2x128xf32> to vector<1x1x2x128xf32>
    tpu.vector_store %arg4[%c0_34, %c2_35, %c0_36, %c0_37], %50 {strides = array<i32>} : memref<1x3x2x128xf32, #tpu.memory_space<vmem>>, vector<1x1x2x128xf32>,
    return
  }
  func.func @transform_0(%arg0: i32, %arg1: i32) -> (i32, i32, i32) {
    %c1_i32 = arith.constant 1 : i32
    %0 = arith.muli %arg0, %c1_i32 : i32
    %1 = arith.addi %0, %arg1 : i32
    %c0_i32 = arith.constant 0 : i32
    %c0_i32_0 = arith.constant 0 : i32
    %c0_i32_1 = arith.constant 0 : i32
    return %c0_i32, %1, %c0_i32_0 : i32, i32, i32
  }
  func.func @transform_1(%arg0: i32, %arg1: i32) -> (i32, i32, i32) {
    %c1_i32 = arith.constant 1 : i32
    %0 = arith.muli %arg0, %c1_i32 : i32
    %1 = arith.addi %0, %arg1 : i32
    %c0_i32 = arith.constant 0 : i32
    %c0_i32_0 = arith.constant 0 : i32
    %c0_i32_1 = arith.constant 0 : i32
    return %c0_i32, %1, %c0_i32_0 : i32, i32, i32
  }
  func.func @transform_2(%arg0: i32, %arg1: i32) -> (i32, i32, i32, i32) {
    %c0_i32 = arith.constant 0 : i32
    %c0_i32_0 = arith.constant 0 : i32
    %c0_i32_1 = arith.constant 0 : i32
    %c0_i32_2 = arith.constant 0 : i32
    return %arg0, %c0_i32, %c0_i32_0, %c0_i32_1 : i32, i32, i32, i32
  }
}

</mosaic_0001>

<bundles_post_ra>
// kernel: tpu_custom_call.1
= control target key start
LH: loop header
LB: loop body
LE: loop exit
PB: predicated region body
PF: predicated region fallthrough
CT: control target
= control target key end

     0   :  { %7 = vsyncpa [#allocation3], 0  ;;  %s350_s0 = inlined_call_operand.hbm [shape: f32[2,8,128], index: 0, kind: input, shape index: {}]   ;;  %s351_s1 = inlined_call_operand.hbm [shape: f32[2,8,128], index: 1, kind: input, shape index: {}]   ;;  %s352_s2 = inlined_call_operand.hbm [shape: f32[1,3,2,128], index: 2, kind: output, shape index: {}]  }
   0x1   :  { %8 = vsyncpa [#allocation6], 0 }
   0x2   :  { %9 = vsyncpa [#allocation4], 0  ;;  %s17_s11 = sshll.u32 %s350_s0, 4  ;;  %s310_s12 = smov [#allocation2]   ;;  %s18_s11 = int_to_ptr.hbm [resolvable:$true] %s17_s11 }
   0x3   :  { %s19_s13 = sshll.u32 %s310_s12, 4  ;;  %s33_s16 = sshll.u32 %s351_s1, 4  ;;  %s20_s13 = int_to_ptr.vmem [resolvable:$true] %s19_s13  ;;  %s34_s16 = int_to_ptr.hbm [resolvable:$true] %s33_s16 }
   0x4   :  { %s311_s17 = smov 128   ;;  %s312_s18 = smov 8  }
   0x5   :  { %25 = dma.hbm_to_vmem [thread:$0]  %s18_s11, 256, %s20_s13, [#allocation3], %s311_s17, %s311_s17, %s312_s18  }
   0x6   :  { %s313_s19 = smov [#allocation5]  }
   0x7   :  { %s35_s20 = sshll.u32 %s313_s19, 4  ;;  %s36_s20 = int_to_ptr.vmem [resolvable:$true] %s35_s20 }
   0x8   :  { %41 = dma.hbm_to_vmem [thread:$0]  %s34_s16, 256, %s36_s20, [#allocation6], %s311_s17, %s311_s17, %s312_s18  }
   0x9   :  { %304 = dma.done.wait [#allocation3], 256  }
   0xa   :  { %305 = vsyncadd [#allocation3], 4294967040 }
   0xb   :  { %306 = dma.done.wait [#allocation6], 256  }
   0xc   :  { %307 = vsyncadd [#allocation6], 4294967040  ;;  %v314_v0 = vmov 0.0   ;;  %v59_v1 = vld [vmem:[#allocation2] sm:$0xff]  ;;  %v60_v2 = vld [vmem:[#allocation2 + $0x8] sm:$0xff]  ;;  %v315_v61 = vmov 0.75  }
   0xd   :  { %56 = vst [vmem:[#allocation7] sm:$0x3] %v314_v0  ;;  %v209_v3 = vmul.f32 -1.442695, %v59_v1  ;;  %v210_v4 = vmul.f32 -1.442695, %v60_v2 }
   0xe   :  { %57 = vst [vmem:[#allocation7 + $0x2] sm:$0x3] %v314_v0  ;;  %v61_v22 = vld [vmem:[#allocation5] sm:$0xff]  ;;  %v62_v23 = vld [vmem:[#allocation5 + $0x8] sm:$0xff]  ;;  %vm144_vm10 = vcmask 1041409   ;;  %s316_s0 = smov [#allocation7]  }
   0xf   :  { %58 = vst [vmem:[#allocation7 + $0x4] sm:$0x3] %v314_v0  ;;  %220 = vpow2.f32 %v209_v3  ;;  %vm101_vm8 = vcmp.eq.f32.partialorder %v61_v22, 1.0  ;;  %vm102_vm9 = vcmp.eq.f32.partialorder %v62_v23, 1.0  ;;  %s193_s1 = sshll.u32 %s316_s0, 4  ;;  %s195_s23 = sshll.u32 %s352_s2, 4  ;;  %s194_s1 = int_to_ptr.vmem [resolvable:$true] %s193_s1  ;;  %s196_s23 = int_to_ptr.hbm [resolvable:$true] %s195_s23 }
  0x10   :  { %222 = vpow2.f32 %v210_v4  ;;  %v107_v62 = vsel %vm101_vm8, 0.25, %v315_v61  ;;  %v108_v3 = vsel %vm102_vm9, 0.25, %v315_v61  ;;  %s317_s24 = smov 32   ;;  %s318_s25 = smov 2  }
  0x15   :  { %v221_v5 = vpop.eup %220 }
  0x16   :  { %v223_v6 = vpop.eup %222  ;;  %v69_v7 = vadd.f32 1.0, %v221_v5 }
  0x17   :  { %v70_v8 = vadd.f32 1.0, %v223_v6 }
  0x18   :  { %224 = vrcp.f32 %v69_v7  ;;  %vm76_vm0 = vweird.f32 %v69_v7  ;;  %v82_v12 = vand.u32 2147483648, %v69_v7  ;;  %v80_v15 = vand.u32 2147483647, %v69_v7 }
  0x19   :  { %226 = vrcp.f32 %v70_v8  ;;  %v97_v16 = vand.u32 2147483648, %v70_v8  ;;  %vm91_vm2 = vweird.f32 %v70_v8  ;;  %v95_v18 = vand.u32 2147483647, %v70_v8 }
  0x1a   :  { %v83_v20 = vor.u32 1.1754944e-38, %v82_v12  ;;  %vm81_vm5 = vcmp.eq.f32.partialorder %v80_v15, 8.507059e+37 }
  0x1b   :  { %v98_v25 = vor.u32 1.1754944e-38, %v97_v16  ;;  %vm96_vm7 = vcmp.eq.f32.partialorder %v95_v18, 8.507059e+37 }
  0x1e   :  { %v225_v9 = vpop.eup %224 }
  0x1f   :  { %v227_v10 = vpop.eup %226  ;;  %v72_v11 = vmul.f32 %v225_v9, %v69_v7  ;;  %vm77_vm1 = vweird.f32 %v225_v9 }
  0x20   :  { %v87_v13 = vmul.f32 %v227_v10, %v70_v8  ;;  %vm92_vm3 = vweird.f32 %v227_v10  ;;  %vm78_vm4 = vmor %vm76_vm0, %vm77_vm1  ;;  %v129_v8 = vld [vmem:[#allocation7] sm:$0x3] }
  0x21   :  { %v73_v14 = vsub.f32 1.0, %v72_v11  ;;  %vm93_vm6 = vmor %vm91_vm2, %vm92_vm3 }
  0x22   :  { %v88_v17 = vsub.f32 1.0, %v87_v13 }
  0x23   :  { %v74_v19 = vmul.f32 %v225_v9, %v73_v14 }
  0x24   :  { %v89_v21 = vmul.f32 %v227_v10, %v88_v17 }
  0x25   :  { %v75_v24 = vadd.f32 %v225_v9, %v74_v19 }
  0x26   :  { %v90_v26 = vadd.f32 %v227_v10, %v89_v21 }
  0x27   :  { %v79_v27 = vsel %vm78_vm4, %v225_v9, %v75_v24 }
  0x28   :  { %v84_v28 = vsel %vm81_vm5, %v83_v20, %v79_v27  ;;  %v94_v29 = vsel %vm93_vm6, %v227_v10, %v90_v26  ;;  %v150_v10 = vld [vmem:[#allocation7 + $0x2] sm:$0x3] }
  0x29   :  { %v99_v30 = vsel %vm96_vm7, %v98_v25, %v94_v29  ;;  %v103_v31 = vsub.f32 1.0, %v84_v28  ;;  %v125_v32 = vmul.f32 %v84_v28, %v61_v22  ;;  %v127_v33 = vadd.f32 %v84_v28, %v61_v22 }
  0x2a   :  { %v104_v34 = vsub.f32 1.0, %v99_v30  ;;  %v126_v35 = vmul.f32 %v99_v30, %v62_v23  ;;  %v128_v36 = vadd.f32 %v99_v30, %v62_v23 }
  0x2b   :  { %v130_v37 = vrot.slane %v125_v32, 4  ;;  %v151_v38 = vrot.slane %v127_v33, 4  ;;  %v105_v39 = vsel %vm101_vm8, %v84_v28, %v103_v31 }
  0x2c   :  { %v136_v40 = vrot.slane %v126_v35, 4  ;;  %v157_v41 = vrot.slane %v128_v36, 4  ;;  %v106_v42 = vsel %vm102_vm9, %v99_v30, %v104_v34  ;;  %228 = vlog2.f32 %v105_v39 }
  0x2d   :  { %v131_v43 = vadd.f32 %v130_v37, %v125_v32  ;;  %v152_v44 = vadd.f32 %v151_v38, %v127_v33  ;;  %v109_v47 = vsub.f32 1.0, %v105_v39  ;;  %230 = vlog2.f32 %v106_v42 }
  0x2e   :  { %v137_v45 = vadd.f32 %v136_v40, %v126_v35  ;;  %v158_v46 = vadd.f32 %v157_v41, %v128_v36  ;;  %v110_v50 = vsub.f32 1.0, %v106_v42  ;;  %v170_v35 = vld [vmem:[#allocation7 + $0x4] sm:$0x3] }
  0x2f   :  { %v132_v48 = vrot.slane %v131_v43, 2  ;;  %v153_v49 = vrot.slane %v152_v44, 2  ;;  %v111_v57 = vmul.f32 %v109_v47, %v109_v47 }
  0x30   :  { %v138_v51 = vrot.slane %v137_v45, 2  ;;  %v159_v52 = vrot.slane %v158_v46, 2  ;;  %v112_v63 = vmul.f32 %v110_v50, %v110_v50 }
  0x31   :  { %v133_v53 = vadd.f32 %v132_v48, %v131_v43  ;;  %v154_v54 = vadd.f32 %v153_v49, %v152_v44  ;;  %v121_v13 = vmul.f32 %v111_v57, %v107_v62 }
  0x32   :  { %v139_v55 = vadd.f32 %v138_v51, %v137_v45  ;;  %v160_v56 = vadd.f32 %v159_v52, %v158_v46  ;;  %v229_v58 = vpop.eup %228  ;;  %v122_v15 = vmul.f32 %v112_v63, %v108_v3 }
  0x33   :  { %v134_v59 = vrot.slane %v133_v53, 1  ;;  %v155_v60 = vrot.slane %v154_v54, 1  ;;  %v231_v0 = vpop.eup %230  ;;  %v114_v4 = vmul.f32 0.6931472, %v229_v58 }
  0x34   :  { %v140_v1 = vrot.slane %v139_v55, 1  ;;  %v161_v2 = vrot.slane %v160_v56, 1  ;;  %v116_v7 = vmul.f32 0.6931472, %v231_v0 }
  0x35   :  { %v135_v5 = vadd.f32 %v134_v59, %v133_v53  ;;  %v156_v6 = vadd.f32 %v155_v60, %v154_v54  ;;  %v117_v12 = vmax.f32 %v114_v4, -100.0 }
  0x36   :  { %v141_v9 = vadd.f32 %v140_v1, %v139_v55  ;;  %v162_v11 = vadd.f32 %v161_v2, %v160_v56  ;;  %v118_v14 = vmax.f32 %v116_v7, -100.0 }
  0x37   :  { %v119_v18 = vsub.f32 0.0, %v117_v12 }
  0x38   :  { %v145_v16 = vsel %vm144_vm10, %v141_v9, %v135_v5  ;;  %v165_v17 = vsel %vm144_vm10, %v162_v11, %v156_v6  ;;  %v120_v21 = vsub.f32 0.0, %v118_v14 }
  0x39   :  { %v147_v19 = vadd.f32 %v145_v16, %v129_v8  ;;  %v167_v20 = vadd.f32 %v165_v17, %v150_v10  ;;  %v123_v22 = vmul.f32 %v121_v13, %v119_v18 }
  0x3a   :  { %v124_v23 = vmul.f32 %v122_v15, %v120_v21 }
  0x3b   :  { %148 = vst [vmem:[#allocation7] sm:$0x3] %v147_v19  ;;  %v171_v24 = vrot.slane %v123_v22, 4 }
  0x3c   :  { %168 = vst [vmem:[#allocation7 + $0x2] sm:$0x3] %v167_v20  ;;  %v177_v25 = vrot.slane %v124_v23, 4 }
  0x3d   :  { %v172_v26 = vadd.f32 %v171_v24, %v123_v22 }
  0x3e   :  { %v178_v27 = vadd.f32 %v177_v25, %v124_v23 }
  0x3f   :  { %v173_v28 = vrot.slane %v172_v26, 2 }
  0x40   :  { %v179_v29 = vrot.slane %v178_v27, 2 }
  0x41   :  { %v174_v30 = vadd.f32 %v173_v28, %v172_v26 }
  0x42   :  { %v180_v31 = vadd.f32 %v179_v29, %v178_v27 }
  0x43   :  { %v175_v32 = vrot.slane %v174_v30, 1 }
  0x44   :  { %v181_v33 = vrot.slane %v180_v31, 1 }
  0x45   :  { %v176_v34 = vadd.f32 %v175_v32, %v174_v30 }
  0x46   :  { %v182_v36 = vadd.f32 %v181_v33, %v180_v31 }
  0x48   :  { %v185_v37 = vsel %vm144_vm10, %v182_v36, %v176_v34 }
  0x49   :  { %v187_v38 = vadd.f32 %v185_v37, %v170_v35 }
  0x4b   :  { %188 = vst [vmem:[#allocation7 + $0x4] sm:$0x3] %v187_v38 }
  0x4c   :  { %201 = dma.vmem_to_hbm [thread:$0]  %s194_s1, 96, %s196_s23, [#allocation4], %s317_s24, %s317_s24, %s318_s25  }
  0x4d   :  { %308 = dma.done.wait [#allocation4], 96  }
  0x4e   :  { %309 = vsyncadd [#allocation4], 4294967200 }
  0x4f   :  { %206 = vsyncpa [#allocation3], 1 }
  0x50   :  { %207 = vsyncpa [#allocation6], 1 }
  0x51   :  { %208 = vsyncpa [#allocation4], 1 }

</bundles_post_ra>
